<compile_context>
chip_gen: v6e
topology: v6e:2x2x1
jax: 0.10.0
libtpu: 0.0.40
codegen_flags: <defaults>
</compile_context>

<pallas_src>
import functools

import jax
import jax.numpy as jnp
from jax.experimental import pallas as pl
from jax.experimental.pallas import tpu as pltpu


# ---------------------------------------------------------------------------
# Kernel 1: tiled fused matmul
#   y = [relu]( ([relu](x*in_s + in_b)) @ W * out_s + out_b [+ residual] )
# Grid = (M/tm, N/tn, K/tk); f32 accumulator in VMEM scratch; K axis is the
# reduction ("arbitrary"), M/N axes are "parallel" (megacore-shardable).
# ---------------------------------------------------------------------------
def _fused_matmul_kernel(*refs, has_in_affine, in_relu, has_out_affine,
                         has_residual, out_relu):
    it = iter(refs)
    x_ref = next(it)
    w_ref = next(it)
    is_ref = ib_ref = os_ref = ob_ref = res_ref = None
    if has_in_affine:
        is_ref = next(it)
        ib_ref = next(it)
    if has_out_affine:
        os_ref = next(it)
        ob_ref = next(it)
    if has_residual:
        res_ref = next(it)
    o_ref = next(it)
    acc_ref = next(it)

    @pl.when(pl.program_id(2) == 0)
    def _():
        acc_ref[...] = jnp.zeros_like(acc_ref)

    x = x_ref[...]
    if has_in_affine:
        x = x * is_ref[...] + ib_ref[...]
    if in_relu:
        x = jnp.maximum(x, 0.0)
    # bf16 MXU inputs, f32 accumulation.
    acc_ref[...] += jnp.dot(x.astype(jnp.bfloat16), w_ref[...],
                            preferred_element_type=jnp.float32)

    @pl.when(pl.program_id(2) == pl.num_programs(2) - 1)
    def _():
        y = acc_ref[...]
        if has_out_affine:
            y = y * os_ref[...] + ob_ref[...]
        if has_residual:
            y = y + res_ref[...]
        if out_relu:
            y = jnp.maximum(y, 0.0)
        o_ref[...] = y


def _pick_tile(dim, target, align):
    """Largest multiple of `align` dividing `dim` and <= target, else full dim
    (full-extent blocks are always layout-legal)."""
    if dim <= target or dim % align != 0:
        return dim
    t = (target // align) * align
    while t >= align:
        if dim % t == 0:
            return t
        t -= align
    return dim


def fused_matmul(x, w, in_scale=None, in_shift=None, out_scale=None,
                 out_shift=None, residual=None, in_relu=False, out_relu=False,
                 tm=256, tn=256, tk=512):
    M, K = x.shape
    Kw, N = w.shape
    assert K == Kw
    has_in = in_scale is not None
    has_out = out_scale is not None
    has_res = residual is not None

    w = w.astype(jnp.bfloat16)         # no-op if weights already stored bf16
    tm = _pick_tile(M, tm, 8)
    tn = _pick_tile(N, tn, 128)
    tk = _pick_tile(K, tk, 128)
    grid = (M // tm, N // tn, K // tk)

    operands = [x, w]
    in_specs = [pl.BlockSpec((tm, tk), lambda i, j, k: (i, k)),
                pl.BlockSpec((tk, tn), lambda i, j, k: (k, j))]
    if has_in:
        operands += [in_scale, in_shift]
        in_specs += [pl.BlockSpec((1, tk), lambda i, j, k: (0, k)),
                     pl.BlockSpec((1, tk), lambda i, j, k: (0, k))]
    if has_out:
        operands += [out_scale, out_shift]
        in_specs += [pl.BlockSpec((1, tn), lambda i, j, k: (0, j)),
                     pl.BlockSpec((1, tn), lambda i, j, k: (0, j))]
    if has_res:
        operands += [residual]
        in_specs += [pl.BlockSpec((tm, tn), lambda i, j, k: (i, j))]

    kernel = functools.partial(
        _fused_matmul_kernel, has_in_affine=has_in, in_relu=in_relu,
        has_out_affine=has_out, has_residual=has_res, out_relu=out_relu)

    return pl.pallas_call(
        kernel,
        out_shape=jax.ShapeDtypeStruct((M, N), jnp.float32),
        grid=grid,
        in_specs=in_specs,
        out_specs=pl.BlockSpec((tm, tn), lambda i, j, k: (i, j)),
        scratch_shapes=[pltpu.VMEM((tm, tn), jnp.float32)],
        compiler_params=pltpu.CompilerParams(
            dimension_semantics=("parallel", "parallel", "arbitrary")),
    )(*operands)


# ---------------------------------------------------------------------------
# Kernel 2: attention with absolute positional logits.
# One grid cell per batch, heads folded into lanes.  Consumes qkv directly as
# (HW, 3*heads*d) (channel order "h d", matching PyTorch's chunk/rearrange) and
# writes a single lane-dense (HW, heads*d) output slab.
#   sim_h = scale * q_h @ (k_h + emb)^T ; softmax ; out_h = attn_h @ v_h
# TODO(synk): for large feature maps (H*W >~ 2k) switch to a kv-tiled online
#   softmax (flash-style) so the (HW, HW) score matrix never fully materializes.
# ---------------------------------------------------------------------------
def _attention_kernel(qkv_ref, emb_ref, o_ref, *, heads, dim_head, inner, scale):
    emb = emb_ref[...]                                            # (HW, d)
    outs = []
    for h in range(heads):                                        # static, small
        lo = h * dim_head
        q = qkv_ref[:, lo:lo + dim_head]                          # (HW, d)
        k = qkv_ref[:, inner + lo:inner + lo + dim_head]
        v = qkv_ref[:, 2 * inner + lo:2 * inner + lo + dim_head]
        qs = (q * scale).astype(jnp.bfloat16)
        ke = (k + emb).astype(jnp.bfloat16)                       # content + pos keys
        s = jax.lax.dot_general(qs, ke, (((1,), (1,)), ((), ())),
                                preferred_element_type=jnp.float32)   # (HW, HW)
        m = jnp.max(s, axis=-1, keepdims=True)
        p = jnp.exp(s - m)
        attn = p * pl.reciprocal(jnp.sum(p, axis=-1, keepdims=True), approx=True)
        outs.append(jnp.dot(attn.astype(jnp.bfloat16), v.astype(jnp.bfloat16),
                            preferred_element_type=jnp.float32))
    # single lane-dense store of (HW, heads*d), channel order (head, d)
    o_ref[...] = jnp.concatenate(outs, axis=-1)


def attention(qkv, emb, heads, dim_head, scale):
    B, HW, three_inner = qkv.shape
    inner = heads * dim_head
    assert three_inner == 3 * inner
    kernel = functools.partial(_attention_kernel, heads=heads,
                               dim_head=dim_head, inner=inner, scale=scale)
    return pl.pallas_call(
        kernel,
        out_shape=jax.ShapeDtypeStruct((B, HW, inner), jnp.float32),
        grid=(B,),
        in_specs=[pl.BlockSpec((None, HW, 3 * inner), lambda b: (b, 0, 0)),
                  pl.BlockSpec((HW, dim_head), lambda b: (0, 0))],
        out_specs=pl.BlockSpec((None, HW, inner), lambda b: (b, 0, 0)),
        compiler_params=pltpu.CompilerParams(
            dimension_semantics=("parallel",)),
    )(qkv, emb)


# ---------------------------------------------------------------------------
# Glue: im2col for the strided 3x3 shortcut conv (pure reshape/slice).
# TODO(synk): patches are materialized in HBM; for large feature maps gather
#   the 9 taps inside the kernel (or use a conv lowering) instead.
# ---------------------------------------------------------------------------
def _im2col(x, ksize, stride, pad):
    B, H, W, C = x.shape
    xp = jnp.pad(x, ((0, 0), (pad, pad), (pad, pad), (0, 0)))
    Ho = (H + 2 * pad - ksize) // stride + 1
    Wo = (W + 2 * pad - ksize) // stride + 1
    cols = []
    for di in range(ksize):
        for dj in range(ksize):
            cols.append(xp[:, di:di + stride * Ho:stride,
                           dj:dj + stride * Wo:stride, :])
    patches = jnp.stack(cols, axis=3)                 # (B, Ho, Wo, k*k, C)
    return patches.reshape(B * Ho * Wo, ksize * ksize * C), Ho, Wo


# ---------------------------------------------------------------------------
# Parameters (deterministic, synthetic).  BatchNorm is pre-folded to
# per-channel (scale, shift) pairs (eval-mode semantics).  Conv weights are
# stored in bf16 (MXU dtype); BN affines / pos-embs stay f32.
# ---------------------------------------------------------------------------
def _make_bn(key, c, eps=1e-5):
    k1, k2, k3, k4 = jax.random.split(key, 4)
    gamma = 1.0 + 0.1 * jax.random.normal(k1, (c,), jnp.float32)
    beta = 0.1 * jax.random.normal(k2, (c,), jnp.float32)
    mean = 0.1 * jax.random.normal(k3, (c,), jnp.float32)
    var = 1.0 + 0.1 * jax.random.uniform(k4, (c,), jnp.float32)
    scale = gamma / jnp.sqrt(var + eps)
    shift = beta - mean * scale
    return scale.reshape(1, c), shift.reshape(1, c)


def init_block_params(key, dim, dim_out, fmap, heads, dim_head, proj_factor,
                      downsample):
    attn_dim = dim_out // proj_factor
    inner = heads * dim_head
    ks = jax.random.split(key, 10)
    p = {'downsample': downsample}
    if dim != dim_out or downsample:
        ksize, stride, pad = (3, 2, 1) if downsample else (1, 1, 0)
        w = (0.1 * jax.random.normal(ks[0], (ksize * ksize * dim, dim_out),
                                     jnp.float32)).astype(jnp.bfloat16)
        p['shortcut'] = (w, _make_bn(ks[1], dim_out), ksize, stride, pad)
    else:
        p['shortcut'] = None
    p['conv1_w'] = (0.1 * jax.random.normal(ks[2], (dim, attn_dim),
                                            jnp.float32)).astype(jnp.bfloat16)
    p['bn1'] = _make_bn(ks[3], attn_dim)
    # qkv columns ordered [q | k | v], each with (head, dim_head) channel layout.
    p['qkv_w'] = (0.1 * jax.random.normal(ks[4], (attn_dim, inner * 3),
                                          jnp.float32)).astype(jnp.bfloat16)
    p['pos_h'] = (dim_head ** -0.5) * jax.random.normal(
        ks[5], (fmap[0], dim_head), jnp.float32)
    p['pos_w'] = (dim_head ** -0.5) * jax.random.normal(
        ks[6], (fmap[1], dim_head), jnp.float32)
    p['bn2'] = _make_bn(ks[7], inner)
    p['conv2_w'] = (0.1 * jax.random.normal(ks[8], (inner, dim_out),
                                            jnp.float32)).astype(jnp.bfloat16)
    p['bn3'] = _make_bn(ks[9], dim_out)
    return p


def init_stack_params(key, dim, fmap_size, dim_out, proj_factor, num_layers,
                      heads, dim_head, downsample):
    params = []
    keys = jax.random.split(key, num_layers)
    for i in range(num_layers):
        is_first = i == 0
        layer_dim = dim if is_first else dim_out
        layer_downsample = is_first and downsample
        div = 2 if (downsample and not is_first) else 1
        layer_fmap = (fmap_size[0] // div, fmap_size[1] // div)
        params.append(init_block_params(keys[i], layer_dim, dim_out, layer_fmap,
                                        heads, dim_head, proj_factor,
                                        layer_downsample))
    return params


# ---------------------------------------------------------------------------
# Forward pass.
# ---------------------------------------------------------------------------
def bottle_block_forward(x, p, heads, dim_head):
    B, H, W, C = x.shape
    inner = heads * dim_head
    HW = H * W

    # ---- shortcut branch ----
    if p['shortcut'] is None:
        Ho, Wo = H, W
        shortcut_flat = x.reshape(B * HW, C)
    else:
        sw, (ss, sb), ksize, stride, pad = p['shortcut']
        patches, Ho, Wo = _im2col(x, ksize, stride, pad)
        shortcut_flat = fused_matmul(patches, sw, out_scale=ss, out_shift=sb,
                                     out_relu=True)

    # ---- main branch ----
    x_flat = x.reshape(B * HW, C)
    h1 = fused_matmul(x_flat, p['conv1_w'],
                      out_scale=p['bn1'][0], out_shift=p['bn1'][1],
                      out_relu=True)                               # (BHW, attn_dim)
    qkv = fused_matmul(h1, p['qkv_w']).reshape(B, HW, 3 * inner)   # free reshape

    emb = (p['pos_h'][:, None, :] + p['pos_w'][None, :, :]).reshape(HW, dim_head)
    fmap = attention(qkv, emb, heads, dim_head,
                     float(dim_head) ** -0.5)                      # (B, HW, inner)

    if p['downsample']:  # AvgPool2d((2, 2))
        # TODO(synk): could be fused into the attention epilogue to save one HBM
        # round trip (first block only, small tensor).
        fmap = fmap.reshape(B, H // 2, 2, W // 2, 2, inner).mean(axis=(2, 4))

    fmap_flat = fmap.reshape(B * Ho * Wo, inner)
    out_flat = fused_matmul(
        fmap_flat, p['conv2_w'],
        in_scale=p['bn2'][0], in_shift=p['bn2'][1], in_relu=True,
        out_scale=p['bn3'][0], out_shift=p['bn3'][1],
        residual=shortcut_flat, out_relu=True)
    return out_flat.reshape(B, Ho, Wo, -1)


def bottle_stack_forward(x_nchw, params, heads, dim_head):
    x = jnp.transpose(x_nchw, (0, 2, 3, 1)).astype(jnp.float32)   # NCHW -> NHWC
    for p in params:
        x = bottle_block_forward(x, p, heads, dim_head)
    return jnp.transpose(x, (0, 3, 1, 2))                         # back to NCHW


if __name__ == "__main__":
    key = jax.random.PRNGKey(0)
    kx, kp = jax.random.split(key)

    # small but structurally faithful config
    dim, fmap_size = 4, (8, 8)
    dim_out, proj_factor, num_layers = 32, 4, 3
    heads, dim_head, downsample = 2, 16, True

    x = jax.random.normal(kx, (2, dim, fmap_size[0], fmap_size[1]), jnp.float32)
    params = init_stack_params(kp, dim, fmap_size, dim_out, proj_factor,
                               num_layers, heads, dim_head, downsample)

    out = bottle_stack_forward(x, params, heads, dim_head)
    out = jax.block_until_ready(out)
    assert out.shape == (2, dim_out, fmap_size[0] // 2, fmap_size[1] // 2), out.shape
    assert jnp.all(jnp.isfinite(out))
    print("KERNEL_OK")
</pallas_src>

<mosaic_0001>
module attributes {stable_mosaic.version = 11 : i64} {
  func.func @_fused_matmul_kernel(%arg0: i32, %arg1: i32, %arg2: i32, %arg3: memref<32x36xf32, #tpu.memory_space<vmem>>, %arg4: memref<36x32xbf16, #tpu.memory_space<vmem>>, %arg5: memref<1x32xf32, #tpu.memory_space<vmem>>, %arg6: memref<1x32xf32, #tpu.memory_space<vmem>>, %arg7: memref<32x32xf32, #tpu.memory_space<vmem>>, %arg8: memref<32x32xf32, #tpu.memory_space<vmem>>) attributes {dimension_semantics = [#tpu.dimension_semantics<parallel>, #tpu.dimension_semantics<parallel>, #tpu.dimension_semantics<arbitrary>], iteration_bounds = array<i64: 1, 1, 1>, scalar_prefetch = 0 : i64, scratch_operands = 1 : i64, tpu.core_type = #tpu.core_type<tc>, window_params = [{transform_indices = @transform_0, window_bounds = array<i64: 32, 36>}, {transform_indices = @transform_1, window_bounds = array<i64: 36, 32>}, {transform_indices = @transform_2, window_bounds = array<i64: 1, 32>}, {transform_indices = @transform_3, window_bounds = array<i64: 1, 32>}, {transform_indices = @transform_4, window_bounds = array<i64: 32, 32>}]} {
    %c0_i32 = arith.constant 0 : i32
    %0 = arith.cmpi eq, %arg2, %c0_i32 : i32
    %1 = arith.extui %0 : i1 to i32
    %c0_i32_0 = arith.constant 0 : i32
    %2 = arith.cmpi ne, %1, %c0_i32_0 : i32
    scf.if %2 {
      %cst_10 = arith.constant 0.000000e+00 : f32
      %13 = vector.broadcast %cst_10 : f32 to vector<32x32xf32>
      %c0_11 = arith.constant 0 : index
      %c0_12 = arith.constant 0 : index
      %14 = vector.load %arg8[%c0_11, %c0_12] : memref<32x32xf32, #tpu.memory_space<vmem>>, vector<32x32xf32>
      tpu.vector_store %arg8[%c0_11, %c0_12], %13 {strides = array<i32>} : memref<32x32xf32, #tpu.memory_space<vmem>>, vector<32x32xf32>,
    } else {
    }
    %c0 = arith.constant 0 : index
    %c0_1 = arith.constant 0 : index
    %3 = vector.load %arg3[%c0, %c0_1] : memref<32x36xf32, #tpu.memory_space<vmem>>, vector<32x36xf32>
    %c0_2 = arith.constant 0 : index
    %c0_3 = arith.constant 0 : index
    %4 = vector.load %arg8[%c0_2, %c0_3] : memref<32x32xf32, #tpu.memory_space<vmem>>, vector<32x32xf32>
    %5 = arith.truncf %3 : vector<32x36xf32> to vector<32x36xbf16>
    %c0_4 = arith.constant 0 : index
    %c0_5 = arith.constant 0 : index
    %6 = vector.load %arg4[%c0_4, %c0_5] : memref<36x32xbf16, #tpu.memory_space<vmem>>, vector<36x32xbf16>
    %cst = arith.constant dense<0.000000e+00> : vector<32x32xf32>
    %7 = tpu.matmul %5, %6, %cst {dimension_numbers = #tpu.dot_dimension_numbers<[1], [0], [0], [1], [0, 0, 1, 1], [], []>} : vector<32x36xbf16>, vector<36x32xbf16>, vector<32x32xf32> -> vector<32x32xf32>
    %8 = arith.addf %4, %7 : vector<32x32xf32>
    %c0_6 = arith.constant 0 : index
    %c0_7 = arith.constant 0 : index
    %9 = vector.load %arg8[%c0_6, %c0_7] : memref<32x32xf32, #tpu.memory_space<vmem>>, vector<32x32xf32>
    tpu.vector_store %arg8[%c0_6, %c0_7], %8 {strides = array<i32>} : memref<32x32xf32, #tpu.memory_space<vmem>>, vector<32x32xf32>,
    %c0_i32_8 = arith.constant 0 : i32
    %10 = arith.cmpi eq, %arg2, %c0_i32_8 : i32
    %11 = arith.extui %10 : i1 to i32
    %c0_i32_9 = arith.constant 0 : i32
    %12 = arith.cmpi ne, %11, %c0_i32_9 : i32
    scf.if %12 {
      %c0_10 = arith.constant 0 : index
      %c0_11 = arith.constant 0 : index
      %13 = vector.load %arg8[%c0_10, %c0_11] : memref<32x32xf32, #tpu.memory_space<vmem>>, vector<32x32xf32>
      %c0_12 = arith.constant 0 : index
      %c0_13 = arith.constant 0 : index
      %14 = vector.load %arg5[%c0_12, %c0_13] : memref<1x32xf32, #tpu.memory_space<vmem>>, vector<1x32xf32>
      %15 = vector.broadcast %14 : vector<1x32xf32> to vector<32x32xf32>
      %16 = arith.mulf %13, %15 : vector<32x32xf32>
      %c0_14 = arith.constant 0 : index
      %c0_15 = arith.constant 0 : index
      %17 = vector.load %arg6[%c0_14, %c0_15] : memref<1x32xf32, #tpu.memory_space<vmem>>, vector<1x32xf32>
      %18 = vector.broadcast %17 : vector<1x32xf32> to vector<32x32xf32>
      %19 = arith.addf %16, %18 : vector<32x32xf32>
      %cst_16 = arith.constant 0.000000e+00 : f32
      %20 = vector.broadcast %cst_16 : f32 to vector<32x32xf32>
      %21 = arith.maximumf %19, %20 : vector<32x32xf32>
      %c0_17 = arith.constant 0 : index
      %c0_18 = arith.constant 0 : index
      %22 = vector.load %arg7[%c0_17, %c0_18] : memref<32x32xf32, #tpu.memory_space<vmem>>, vector<32x32xf32>
      tpu.vector_store %arg7[%c0_17, %c0_18], %21 {strides = array<i32>} : memref<32x32xf32, #tpu.memory_space<vmem>>, vector<32x32xf32>,
    } else {
    }
    return
  }
  func.func @transform_0(%arg0: i32, %arg1: i32, %arg2: i32) -> (i32, i32) {
    %c0_i32 = arith.constant 0 : i32
    return %arg0, %arg2 : i32, i32
  }
  func.func @transform_1(%arg0: i32, %arg1: i32, %arg2: i32) -> (i32, i32) {
    %c0_i32 = arith.constant 0 : i32
    return %arg2, %arg1 : i32, i32
  }
  func.func @transform_2(%arg0: i32, %arg1: i32, %arg2: i32) -> (i32, i32) {
    %c0_i32 = arith.constant 0 : i32
    %c0_i32_0 = arith.constant 0 : i32
    return %c0_i32, %arg1 : i32, i32
  }
  func.func @transform_3(%arg0: i32, %arg1: i32, %arg2: i32) -> (i32, i32) {
    %c0_i32 = arith.constant 0 : i32
    %c0_i32_0 = arith.constant 0 : i32
    return %c0_i32, %arg1 : i32, i32
  }
  func.func @transform_4(%arg0: i32, %arg1: i32, %arg2: i32) -> (i32, i32) {
    %c0_i32 = arith.constant 0 : i32
    return %arg0, %arg1 : i32, i32
  }
}

</mosaic_0001>

<bundles_post_ra>
// kernel: tpu_custom_call.1
= control target key start
LH: loop header
LB: loop body
LE: loop exit
PB: predicated region body
PF: predicated region fallthrough
CT: control target
= control target key end

     0   :  { %vm65_vm0 = vcmask 1041408   ;;  %vm58_vm1 = vcmask 293888   ;;  %vm23_vm2 = vcmask 261120   ;;  %v232_v7 = vmov 0.0   ;;  %s305_s0 = inlined_call_operand.vmem [shape: f32[32,36], index: 0, kind: input, shape index: {}]   ;;  %s306_s1 = inlined_call_operand.vmem [shape: bf16[36,32], index: 1, kind: input, shape index: {}]   ;;  %s307_s2 = inlined_call_operand.vmem [shape: f32[1,32], index: 2, kind: input, shape index: {}]   ;;  %s308_s3 = inlined_call_operand.vmem [shape: f32[1,32], index: 3, kind: input, shape index: {}]   ;;  %s309_s4 = inlined_call_operand.hbm [shape: f32[32,32], index: 4, kind: output, shape index: {}]  }
   0x1   :  { %v207_v0 = vld [vmem:[%s306_s1 + $0x10] ss:$0 sps:$4 sm:$0x33]   ;;  %v208_v1 = vld [vmem:[%s306_s1 + $0x8] sm:$0xff]   ;;  %v28_v3 = vld [vmem:[%s305_s0] sm:$0xff]  ;;  %26 = vst.msk [vmem:[#allocation2 + $0x10] sm:$0xff] %vm23_vm2, %v232_v7 }
   0x2   :  { %202 = vmatprep.subr.msk.bf16.mxu0 %vm65_vm0, %v207_v0  ;;  %v67_v2 = vsel %vm65_vm0, %v207_v0, 0  ;;  %v29_v4 = vld [vmem:[%s305_s0 + $0x8] sm:$0xff]  ;;  %v209_v5 = vld [vmem:[%s306_s1] sm:$0xff]   ;;  %24 = vst.msk [vmem:[#allocation2] sm:$0xff] %vm23_vm2, %v232_v7  ;;  %25 = vst.msk [vmem:[#allocation2 + $0x8] sm:$0xff] %vm23_vm2, %v232_v7 }
   0x3   :  { %193 = vmatpush3.bf16.msra.mxu0 %v67_v2  ;;  %v36_v6 = vpack.c.bf16 %v29_v4, %v28_v3  ;;  %27 = vst.msk [vmem:[#allocation2 + $0x18] sm:$0xff] %vm23_vm2, %v232_v7 }
   0x4   :  { %194 = vmatprep.subr.bf16.mxu0 %v208_v1 }
   0x5   :  { %9 = vsyncpa [#allocation4], 0  ;;  %198 = vmatprep.mubr.msk.bf16.mxu0 %vm58_vm1, %v36_v6  ;;  %v30_v8 = vld [vmem:[%s305_s0 + $0x10] sm:$0xff]  ;;  %v31_v9 = vld [vmem:[%s305_s0 + $0x18] sm:$0xff] }
   0x6   :  { %v37_v10 = vpack.c.bf16 %v31_v9, %v30_v8  ;;  %v185_v23 = vld [vmem:[%s307_s2] ss:$0 sm:$0xff]  ;;  %s233_s2 = smov [#allocation3]  }
   0x7   :  { %195 = vmatpush3.bf16.msra.mxu0 %v208_v1  ;;  %v186_v25 = vld [vmem:[%s308_s3] ss:$0 sm:$0xff]  ;;  %s169_s5 = sshll.u32 %s233_s2, 4  ;;  %s170_s5 = int_to_ptr.vmem [resolvable:$true] %s169_s5 }
   0x8   :  { %196 = vmatprep.subr.bf16.mxu0 %v209_v5  ;;  %v34_v11 = vld [vmem:[#allocation2 + $0x10] sm:$0xff]  ;;  %s210_s3 = scalar_lea.vmem %s170_s5, 512  ;;  %p215_p1 = scmp.lt.s32.totalorder %s170_s5, %s170_s5 }
   0x9   :  { %v32_v13 = vld [vmem:[#allocation2] sm:$0xff]  ;;  %v33_v19 = vld [vmem:[#allocation2 + $0x8] sm:$0xff]  ;;  %p211_p0 = scmp.ne.s32.totalorder %s170_s5, %s210_s3  ;;  %p216_p2 = scmp.lt.s32.totalorder %s210_s3, %s210_s3 }
   0xa   :  { %v35_v16 = vld [vmem:[#allocation2 + $0x18] sm:$0xff] }
   0xb   :  { %197 = vmatpush3.bf16.msra.mxu0 %v209_v5  ;;  %p217_p3 = por %p216_p2, %p215_p1 }
   0xd   :  { %p218_p4 = pnand %p217_p3, %p211_p0 }
   0xe   :  { %199 = vmatmul.mubr.msk.bf16.vlgmr.msra.gmra.mxu0 %vm58_vm1, %v37_v10 }
  0xce   :  { %v200_v12 = vpop.f32.mrf.mxu0 }
  0xcf   :  { %v120_v14 = vadd.f32 %v200_v12, %v34_v11 }
  0xd0   :  { %v103_v15 = vpop.f32.mrf.mxu0 }
  0xd1   :  { %125 = vst.msk [vmem:[#allocation2 + $0x10] sm:$0xff] %vm23_vm2, %v120_v14  ;;  %v118_v17 = vadd.f32 %v103_v15, %v32_v13 }
  0xd2   :  { %v201_v18 = vpop.f32.mrf.mxu0 }
  0xd3   :  { %123 = vst.msk [vmem:[#allocation2] sm:$0xff] %vm23_vm2, %v118_v17  ;;  %v121_v20 = vadd.f32 %v201_v18, %v35_v16 }
  0xd4   :  { %v106_v21 = vpop.f32.mrf.mxu0 }
  0xd5   :  { %126 = vst.msk [vmem:[#allocation2 + $0x18] sm:$0xff] %vm23_vm2, %v121_v20  ;;  %v119_v22 = vadd.f32 %v106_v21, %v33_v19 }
  0xd7   :  { %124 = vst.msk [vmem:[#allocation2 + $0x8] sm:$0xff] %vm23_vm2, %v119_v22 }
  0xd8   :  { %v132_v24 = vld [vmem:[#allocation2 + $0x10] sm:$0xff] }
  0xd9   :  { %v143_v26 = vmul.f32 %v185_v23, %v132_v24 }
  0xda   :  { %v130_v27 = vld [vmem:[#allocation2] sm:$0xff] }
  0xdb   :  { %v141_v28 = vmul.f32 %v185_v23, %v130_v27  ;;  %v154_v29 = vadd.f32 %v186_v25, %v143_v26 }
  0xdc   :  { %v133_v30 = vld [vmem:[#allocation2 + $0x18] sm:$0xff] }
  0xdd   :  { %v144_v31 = vmul.f32 %v185_v23, %v133_v30  ;;  %v152_v32 = vadd.f32 %v186_v25, %v141_v28  ;;  %v158_v33 = vmax.f32 %v154_v29, 0.0 }
  0xde   :  { %v131_v34 = vld [vmem:[#allocation2 + $0x8] sm:$0xff] }
  0xdf   :  { %v142_v35 = vmul.f32 %v185_v23, %v131_v34  ;;  %v155_v36 = vadd.f32 %v186_v25, %v144_v31  ;;  %v156_v37 = vmax.f32 %v152_v32, 0.0  ;;  %162 = vst.msk [vmem:[#allocation3 + $0x10] sm:$0xff] %vm23_vm2, %v158_v33 }
  0xe1   :  { %v153_v38 = vadd.f32 %v186_v25, %v142_v35  ;;  %v159_v39 = vmax.f32 %v155_v36, 0.0  ;;  %160 = vst.msk [vmem:[#allocation3] sm:$0xff] %vm23_vm2, %v156_v37 }
  0xe3   :  { %v157_v40 = vmax.f32 %v153_v38, 0.0  ;;  %163 = vst.msk [vmem:[#allocation3 + $0x18] sm:$0xff] %vm23_vm2, %v159_v39 }
  0xe5   :  { %161 = vst.msk [vmem:[#allocation3 + $0x8] sm:$0xff] %vm23_vm2, %v157_v40 }
  0xe6   :  { %221 = shalt.err (!%p218_p4)
}
  0xe7   :  { %s234_s6 = smov 128   ;;  %s235_s7 = smov 8  }
  0xe8   :  { %175 = dma.vmem_to_hbm [thread:$0]  %s170_s5, 512, %s309_s4, [#allocation4], %s234_s6, %s234_s6, %s235_s7  }
  0xe9   :  { %230 = dma.done.wait [#allocation4], 512  }
  0xea   :  { %231 = vsyncadd [#allocation4], 4294966784 }
  0xeb   :  { %179 = vsyncpa [#allocation4], 1 }

</bundles_post_ra>
